<compile_context>
chip_gen: v6e
topology: v6e:2x2x1
jax: 0.10.0
libtpu: 0.0.40
codegen_flags: <defaults>
</compile_context>

<pallas_src>
import numpy as np
import jax
import jax.numpy as jnp
from jax.experimental import pallas as pl
from jax.experimental.pallas import tpu as pltpu


# ----------------------------- Pallas kernel ------------------------------ #

def _one_hot_kernel(tok_ref, out_ref):
    """tok_ref: (TILE_ROWS, 1) int32 in VMEM; out_ref: (TILE_ROWS, V) f32/bf16."""
    tok = tok_ref[...]                                            # (T, 1) int32
    v = out_ref.shape[-1]
    lane_ids = jax.lax.broadcasted_iota(jnp.int32, (1, v), dimension=1)
    # (T, 1) == (1, V) broadcast compare -> (T, V); feeds the store directly,
    # no output-sized iota is ever materialized.
    out_ref[...] = (tok == lane_ids).astype(out_ref.dtype)


# ----------------------------- tiling helpers ------------------------------ #

def _round_up(x: int, m: int) -> int:
    return -(-x // m) * m


def _vmem_capacity_bytes() -> int:
    """Physical VMEM capacity; conservative default if introspection unavailable."""
    try:
        cap = int(getattr(pltpu.get_tpu_info(), "vmem_capacity_bytes", 0))
        if cap > 0:
            return cap
    except Exception:
        pass
    return 64 * 1024 * 1024          # v7x per-TC size: safe lower bound everywhere


def _pick_tile_rows(n_rows: int, vocab_size: int, out_itemsize: int):
    """Rows per tile + scoped VMEM limit, generation-aware.

    Pipelined footprint = 2 x output tile + 2 x token tile, where the (rows, 1)
    int32 token column is lane-padded to 128 lanes (512 B/row) and the output
    last dim is lane-padded to a multiple of 128 in VMEM.
    """
    cap = _vmem_capacity_bytes()
    data_budget = min(cap // 4, 32 * 1024 * 1024)   # v7x ~16 MiB, v5e/v6e 32 MiB
    vmem_limit = min(cap // 2, 64 * 1024 * 1024)    # v7x 32 MiB, v5e/v6e 64 MiB

    out_row_bytes = _round_up(vocab_size, 128) * out_itemsize
    tok_row_bytes = 128 * 4                          # (rows, 1) i32, lane-padded
    per_row = 2 * (out_row_bytes + tok_row_bytes)    # double-buffered in + out

    rows = data_budget // per_row
    rows = max(16, min(16384, (rows // 16) * 16))    # 16-aligned (f32 & bf16 packing)
    rows = min(rows, _round_up(max(n_rows, 1), 16))  # don't oversize tiny batches
    return rows, vmem_limit


# -------------------------- pallas_call construction ------------------------ #

# Prefer true 2-TensorCore sharding of the row axis on v7x; fall back to the
# plain "parallel" semantics if a given chip/runtime rejects CORE_PARALLEL.
_DIM_SEMANTICS_CANDIDATES = [
    (pltpu.CORE_PARALLEL,),
    ("parallel",),
]
_dim_semantics_start = 0


def _build_one_hot_call(n: int, vocab_size: int, tile_rows: int, out_dtype,
                        vmem_limit: int, semantics):
    return pl.pallas_call(
        _one_hot_kernel,
        out_shape=jax.ShapeDtypeStruct((n, vocab_size), out_dtype),
        grid=(pl.cdiv(n, tile_rows),),
        in_specs=[pl.BlockSpec((tile_rows, 1), lambda i: (i, 0))],
        out_specs=pl.BlockSpec((tile_rows, vocab_size), lambda i: (i, 0)),
        compiler_params=pltpu.CompilerParams(
            dimension_semantics=semantics,
            vmem_limit_bytes=vmem_limit,
        ),
    )


def one_hot_pallas(tokens: jax.Array, vocab_size: int, dtype=jnp.float32) -> jax.Array:
    """One-hot encode int token ids, shape (B, L, vocab_size).

    Note: ids outside [0, vocab_size) produce an all-zero row (jax.nn.one_hot
    semantics); torch.nn.functional.one_hot would raise instead.  The module
    wrapper below enforces the torch behavior with a host-side check.
    """
    global _dim_semantics_start

    tokens = jnp.asarray(tokens, jnp.int32)
    B, L = tokens.shape
    n = B * L
    tok_flat = tokens.reshape(n, 1)                  # metadata-only reshape

    tile_rows, vmem_limit = _pick_tile_rows(n, vocab_size, jnp.dtype(dtype).itemsize)

    last_err = None
    for idx in range(_dim_semantics_start, len(_DIM_SEMANTICS_CANDIDATES)):
        sem = _DIM_SEMANTICS_CANDIDATES[idx]
        try:
            call = _build_one_hot_call(n, vocab_size, tile_rows, dtype, vmem_limit, sem)
            out = jax.block_until_ready(call(tok_flat))   # (n, vocab_size), unpadded
            _dim_semantics_start = idx                    # remember what lowered OK
            return out.reshape(B, L, vocab_size)          # metadata-only reshape
        except Exception as e:                            # lowering rejected -> fallback
            last_err = e
    raise last_err


# --------------------------- RandomReport module --------------------------- #

class RandomReportPallas:
    """Returns a (deterministically-)random report from a synthetic dataset."""

    def __init__(self, reports_by_id: dict, vocab_size: int, seed: int = 0):
        assert isinstance(reports_by_id, dict)
        self.reports_by_id = reports_by_id
        self.report_choices = list(reports_by_id.keys())
        self.vocab_size = vocab_size
        self._key = jax.random.PRNGKey(seed)

    def _get_random_reports(self, n_reports: int):
        # random.choices(...) equivalent, deterministic via PRNGKey.
        key, self._key = jax.random.split(self._key)
        idxs = np.asarray(
            jax.random.randint(key, (n_reports,), 0, len(self.report_choices))
        )
        return [list(self.reports_by_id[self.report_choices[int(i)]]) for i in idxs]

    def forward(self, images, reports=None, free=False, **unused_kwargs):
        batch_size = images.shape[0]
        chosen = self._get_random_reports(batch_size)

        # pad_sequence(batch_first=True), pad value 0  (host-side glue, as in torch)
        max_len = max(len(r) for r in chosen)
        padded = np.zeros((batch_size, max_len), dtype=np.int32)
        for b, r in enumerate(chosen):
            padded[b, : len(r)] = np.asarray(r, dtype=np.int32)

        # match target length (truncate or right-pad with 0)
        if reports is not None and not free:
            n_target = reports.shape[1]
            if max_len >= n_target:
                padded = padded[:, :n_target]
            else:
                padded = np.pad(padded, ((0, 0), (0, n_target - max_len)))

        # torch.nn.functional.one_hot raises on out-of-range ids; enforce on host.
        if padded.size and (padded.min() < 0 or padded.max() >= self.vocab_size):
            raise ValueError(
                f"token id out of range for vocab_size={self.vocab_size}"
            )

        # one_hot(...).float() on TPU via Pallas.  Padded in-sequence positions
        # (token 0) produce a one-hot at class 0, matching pad_sequence(0)+one_hot.
        # TODO(synk): if downstream only feeds a matmul/embedding, replace the
        # materialized one-hot with a gather and skip this HBM writeback entirely.
        out = one_hot_pallas(jnp.asarray(padded), self.vocab_size, dtype=jnp.float32)
        return (out,)


# ------------------------------- demo / test ------------------------------- #

def _build_synthetic_dataset(num_reports: int, vocab_size: int):
    """Deterministic synthetic reports_by_id (token-id lists of varying length)."""
    reports_by_id = {}
    for i in range(num_reports):
        length = 3 + (i * 2) % 9                           # lengths in [3, 11]
        reports_by_id[f"report_{i}"] = [
            (1 + i * 7 + j * 3) % vocab_size for j in range(length)
        ]
    return reports_by_id


if __name__ == "__main__":
    VOCAB = 128            # vocab maps onto TPU lanes
    BATCH, C, H, W = 2, 4, 16, 16
    SEQ_TARGET = 8

    key = jax.random.PRNGKey(0)
    k_img, k_rep, k_tok = jax.random.split(key, 3)

    images = jax.random.normal(k_img, (BATCH, C, H, W), dtype=jnp.float32)   # NCHW
    target_reports = jax.random.randint(k_rep, (BATCH, SEQ_TARGET), 0, VOCAB)

    # --- unit test of the Pallas one-hot against the JAX reference -------------
    test_tokens = jax.random.randint(k_tok, (BATCH, SEQ_TARGET), 0, VOCAB)
    got = jax.block_until_ready(one_hot_pallas(test_tokens, VOCAB))
    ref = jax.nn.one_hot(test_tokens, VOCAB, dtype=jnp.float32)
    assert got.shape == (BATCH, SEQ_TARGET, VOCAB) and got.dtype == jnp.float32
    assert np.array_equal(np.asarray(got), np.asarray(ref))

    # non-multiple-of-128 vocab + ragged last row tile (masked vst paths)
    VOCAB_ODD = 100
    tok_odd = jax.random.randint(k_tok, (3, 5), 0, VOCAB_ODD)
    got_odd = jax.block_until_ready(one_hot_pallas(tok_odd, VOCAB_ODD))
    ref_odd = jax.nn.one_hot(tok_odd, VOCAB_ODD, dtype=jnp.float32)
    assert np.array_equal(np.asarray(got_odd), np.asarray(ref_odd))

    # optional bf16 output path (halves the HBM writeback for capable consumers)
    got_bf16 = jax.block_until_ready(
        one_hot_pallas(test_tokens, VOCAB, dtype=jnp.bfloat16)
    )
    assert got_bf16.dtype == jnp.bfloat16
    assert np.array_equal(np.asarray(got_bf16, dtype=np.float32), np.asarray(ref))

    # --- full module forward ----------------------------------------------------
    dataset = _build_synthetic_dataset(num_reports=6, vocab_size=VOCAB)
    model = RandomReportPallas(dataset, vocab_size=VOCAB, seed=0)

    (out,) = model.forward(images, reports=target_reports, free=False)
    out = jax.block_until_ready(out)
    assert out.shape == (BATCH, SEQ_TARGET, VOCAB), out.shape
    assert out.dtype == jnp.float32
    row_sums = np.asarray(jnp.sum(out, axis=-1))
    assert np.allclose(row_sums, 1.0), "each position must be a valid one-hot"

    # free=True path (output length = max chosen report length)
    (out_free,) = model.forward(images, reports=None, free=True)
    out_free = jax.block_until_ready(out_free)
    assert out_free.shape[0] == BATCH and out_free.shape[2] == VOCAB
    assert np.allclose(np.asarray(jnp.sum(out_free, axis=-1)), 1.0)

    print("KERNEL_OK")
</pallas_src>

<mosaic_0001>
module attributes {stable_mosaic.version = 11 : i64} {
  func.func @_one_hot_kernel(%arg0: i32, %arg1: memref<16x1xi32, #tpu.memory_space<vmem>>, %arg2: memref<16x128xf32, #tpu.memory_space<vmem>>) attributes {dimension_semantics = [#tpu.dimension_semantics<core_parallel>], iteration_bounds = array<i64: 1>, scalar_prefetch = 0 : i64, scratch_operands = 0 : i64, tpu.core_type = #tpu.core_type<tc>, window_params = [{transform_indices = @transform_0, window_bounds = array<i64: 16, 1>}, {transform_indices = @transform_1, window_bounds = array<i64: 16, 128>}]} {
    %c0 = arith.constant 0 : index
    %c0_0 = arith.constant 0 : index
    %0 = vector.load %arg1[%c0, %c0_0] : memref<16x1xi32, #tpu.memory_space<vmem>>, vector<16x1xi32>
    %1 = tpu.iota {dimensions = array<i32: 1>} : vector<1x128xi32>
    %2 = vector.broadcast %0 : vector<16x1xi32> to vector<16x128xi32>
    %3 = vector.broadcast %1 : vector<1x128xi32> to vector<16x128xi32>
    %4 = arith.cmpi eq, %2, %3 : vector<16x128xi32>
    %5 = arith.extui %4 : vector<16x128xi1> to vector<16x128xi32>
    %6 = arith.sitofp %5 : vector<16x128xi32> to vector<16x128xf32>
    %c0_1 = arith.constant 0 : index
    %c0_2 = arith.constant 0 : index
    %7 = vector.load %arg2[%c0_1, %c0_2] : memref<16x128xf32, #tpu.memory_space<vmem>>, vector<16x128xf32>
    tpu.vector_store %arg2[%c0_1, %c0_2], %6 {strides = array<i32>} : memref<16x128xf32, #tpu.memory_space<vmem>>, vector<16x128xf32>,
    return
  }
  func.func @transform_0(%arg0: i32) -> (i32, i32) {
    %c0_i32 = arith.constant 0 : i32
    %c0_i32_0 = arith.constant 0 : i32
    return %arg0, %c0_i32 : i32, i32
  }
  func.func @transform_1(%arg0: i32) -> (i32, i32) {
    %c0_i32 = arith.constant 0 : i32
    %c0_i32_0 = arith.constant 0 : i32
    return %arg0, %c0_i32 : i32, i32
  }
}

module attributes {stable_mosaic.version = 11 : i64} {
  func.func @_one_hot_kernel(%arg0: i32, %arg1: memref<16x1xi32, #tpu.memory_space<vmem>>, %arg2: memref<16x128xf32, #tpu.memory_space<vmem>>) attributes {dimension_semantics = [#tpu.dimension_semantics<parallel>], iteration_bounds = array<i64: 1>, scalar_prefetch = 0 : i64, scratch_operands = 0 : i64, tpu.core_type = #tpu.core_type<tc>, window_params = [{transform_indices = @transform_0, window_bounds = array<i64: 16, 1>}, {transform_indices = @transform_1, window_bounds = array<i64: 16, 128>}]} {
    %c0 = arith.constant 0 : index
    %c0_0 = arith.constant 0 : index
    %0 = vector.load %arg1[%c0, %c0_0] : memref<16x1xi32, #tpu.memory_space<vmem>>, vector<16x1xi32>
    %1 = tpu.iota {dimensions = array<i32: 1>} : vector<1x128xi32>
    %2 = vector.broadcast %0 : vector<16x1xi32> to vector<16x128xi32>
    %3 = vector.broadcast %1 : vector<1x128xi32> to vector<16x128xi32>
    %4 = arith.cmpi eq, %2, %3 : vector<16x128xi32>
    %5 = arith.extui %4 : vector<16x128xi1> to vector<16x128xi32>
    %6 = arith.sitofp %5 : vector<16x128xi32> to vector<16x128xf32>
    %c0_1 = arith.constant 0 : index
    %c0_2 = arith.constant 0 : index
    %7 = vector.load %arg2[%c0_1, %c0_2] : memref<16x128xf32, #tpu.memory_space<vmem>>, vector<16x128xf32>
    tpu.vector_store %arg2[%c0_1, %c0_2], %6 {strides = array<i32>} : memref<16x128xf32, #tpu.memory_space<vmem>>, vector<16x128xf32>,
    return
  }
  func.func @transform_0(%arg0: i32) -> (i32, i32) {
    %c0_i32 = arith.constant 0 : i32
    %c0_i32_0 = arith.constant 0 : i32
    return %arg0, %c0_i32 : i32, i32
  }
  func.func @transform_1(%arg0: i32) -> (i32, i32) {
    %c0_i32 = arith.constant 0 : i32
    %c0_i32_0 = arith.constant 0 : i32
    return %arg0, %c0_i32 : i32, i32
  }
}

</mosaic_0001>

<bundles_post_ra>
// kernel: tpu_custom_call.1
= control target key start
LH: loop header
LB: loop body
LE: loop exit
PB: predicated region body
PF: predicated region fallthrough
CT: control target
= control target key end

     0   :  { %s2_s6 = sld [smem:[#allocation0]]   ;;  %s133_s0 = inlined_call_operand.vmem [shape: s32[16,1], index: 0, kind: input, shape index: {}]   ;;  %s134_s1 = inlined_call_operand.hbm [shape: f32[16,128], index: 1, kind: output, shape index: {}]  }
   0x6   :  { %s72_s7 = sshll.u32 %s2_s6, 1 }
   0x7   :  { %6 = vsyncpa [#allocation3], 0  ;;  %v109_v0 = vmov 0   ;;  %p21_p0 = scmp.lt.s32.totalorder %s72_s7, 1  ;;  %v29_v3 = vlaneseq  ;;  %s78_s12 = sshll.u32 %s2_s6, 8  ;;  %v111_v6 = vmov 0.0  }
   0x8   :  { %84 = vset.pattern.permute.xlu0 %v109_v0  ;;  %s110_s13 = smov [#allocation2]   ;;  %s52_s17 = scalar_lea.hbm %s134_s1, %s78_s12 }
   0x9   :  { %s136_s7 = smov (!%p21_p0, %s72_s7), 1  ;;  %v30_v4 = vand.u32 127, %v29_v3  ;;  %s53_s14 = sshll.u32 %s110_s13, 4  ;;  %s54_s14 = int_to_ptr.vmem [resolvable:$true] %s53_s14 }
   0xa   :  { %s73_s8 = sshll.u32 %s136_s7, 3  ;;  %p90_p2 = scmp.lt.s32.totalorder %s54_s14, %s54_s14 }
   0xb   :  { %s24_s11 = scalar_lea.vmem %s133_s0, %s73_s8  ;;  %s85_s0 = scalar_lea.vmem %s54_s14, 256 }
   0xc   :  { %v27_v1 = vld [vmem:[%s24_s11] sm:$0xff]  ;;  %v28_v2 = vld [vmem:[%s24_s11 + $0x8] sm:$0xff]  ;;  %p86_p1 = scmp.ne.s32.totalorder %s54_s14, %s85_s0  ;;  %p91_p3 = scmp.lt.s32.totalorder %s85_s0, %s85_s0 }
   0xd   :  { %32 = vperm.xlu0 %84, %v27_v1  }
   0xe   :  { %p92_p4 = por %p91_p3, %p90_p2 }
  0x10   :  { %p93_p5 = pnand %p92_p4, %p86_p1 }
  0x11   :  { %35 = vperm.xlu0 %84, %v28_v2  }
  0x88   :  { %v33_v5 = vpop.permute.xlu0 %32 }
  0x89   :  { %vm37_vm0 = vcmp.eq.s32.totalorder %v33_v5, %v30_v4 }
  0x8a   :  { %v74_v7 = vsel %vm37_vm0, 1.0, %v111_v6 }
  0x8b   :  { %43 = vst [vmem:[#allocation2] sm:$0xff] %v74_v7 }
  0x8c   :  { %v36_v8 = vpop.permute.xlu0 %35 }
  0x8d   :  { %vm38_vm1 = vcmp.eq.s32.totalorder %v36_v8, %v30_v4 }
  0x8e   :  { %v75_v9 = vsel %vm38_vm1, 1.0, %v111_v6 }
  0x8f   :  { %44 = vst [vmem:[#allocation2 + $0x8] sm:$0xff] %v75_v9 }
  0x90   :  { %96 = shalt.err (!%p93_p5)
}
  0x91   :  { %s97_s18 = scalar_lea.hbm %s52_s17, 256  ;;  %s99_s21 = scalar_lea.hbm %s134_s1, 256 }
  0x92   :  { %p98_p6 = scmp.ne.s32.totalorder %s52_s17, %s97_s18  ;;  %p101_p7 = scmp.lt.s32.totalorder %s99_s21, %s97_s18 }
  0x94   :  { %p103_p8 = pnand %p101_p7, %p98_p6 }
  0x96   :  { %106 = shalt.err (!%p103_p8)
}
  0x97   :  { %s112_s22 = smov 128   ;;  %s113_s23 = smov 8  }
  0x98   :  { %59 = dma.vmem_to_hbm [thread:$0]  %s54_s14, 256, %s52_s17, [#allocation3], %s112_s22, %s112_s22, %s113_s23  }
  0x99   :  { %107 = dma.done.wait [#allocation3], 256  }
  0x9a   :  { %108 = vsyncadd [#allocation3], 4294967040 }
  0x9b   :  { %63 = vsyncpa [#allocation3], 1 }

// kernel: tpu_custom_call.1
= control target key start
LH: loop header
LB: loop body
LE: loop exit
PB: predicated region body
PF: predicated region fallthrough
CT: control target
= control target key end

     0   :  { %s97_s0 = inlined_call_operand.vmem [shape: s32[16,1], index: 0, kind: input, shape index: {}]   ;;  %s98_s1 = inlined_call_operand.hbm [shape: f32[16,128], index: 1, kind: output, shape index: {}]  }
   0x1   :  { %v9_v0 = vld [vmem:[%s97_s0] sm:$0xff] }
   0x2   :  { %6 = vsyncpa [#allocation3], 0  ;;  %v73_v1 = vmov 0   ;;  %v10_v2 = vld [vmem:[%s97_s0 + $0x8] sm:$0xff]  ;;  %v11_v3 = vlaneseq  ;;  %s74_s10 = smov [#allocation2]   ;;  %v75_v6 = vmov 0.0  }
   0x3   :  { %50 = vset.pattern.permute.xlu0 %v73_v1  ;;  %s32_s11 = sshll.u32 %s74_s10, 4  ;;  %s33_s11 = int_to_ptr.vmem [resolvable:$true] %s32_s11 }
   0x4   :  { %14 = vperm.xlu0 %50, %v9_v0   ;;  %v12_v4 = vand.u32 127, %v11_v3  ;;  %s51_s12 = scalar_lea.vmem %s33_s11, 256  ;;  %p56_p1 = scmp.lt.s32.totalorder %s33_s11, %s33_s11 }
   0x5   :  { %p52_p0 = scmp.ne.s32.totalorder %s33_s11, %s51_s12  ;;  %p57_p2 = scmp.lt.s32.totalorder %s51_s12, %s51_s12 }
   0x7   :  { %p58_p3 = por %p57_p2, %p56_p1 }
   0x8   :  { %17 = vperm.xlu0 %50, %v10_v2  }
   0x9   :  { %p59_p4 = pnand %p58_p3, %p52_p0 }
  0x7f   :  { %v15_v5 = vpop.permute.xlu0 %14 }
  0x80   :  { %vm19_vm0 = vcmp.eq.s32.totalorder %v15_v5, %v12_v4 }
  0x81   :  { %v43_v7 = vsel %vm19_vm0, 1.0, %v75_v6 }
  0x82   :  { %25 = vst [vmem:[#allocation2] sm:$0xff] %v43_v7 }
  0x83   :  { %v18_v8 = vpop.permute.xlu0 %17 }
  0x84   :  { %vm20_vm1 = vcmp.eq.s32.totalorder %v18_v8, %v12_v4 }
  0x85   :  { %v44_v9 = vsel %vm20_vm1, 1.0, %v75_v6 }
  0x86   :  { %26 = vst [vmem:[#allocation2 + $0x8] sm:$0xff] %v44_v9 }
  0x87   :  { %62 = shalt.err (!%p59_p4)
}
  0x88   :  { %s76_s0 = smov 128   ;;  %s77_s13 = smov 8  }
  0x89   :  { %38 = dma.vmem_to_hbm [thread:$0]  %s33_s11, 256, %s98_s1, [#allocation3], %s76_s0, %s76_s0, %s77_s13  }
  0x8a   :  { %71 = dma.done.wait [#allocation3], 256  }
  0x8b   :  { %72 = vsyncadd [#allocation3], 4294967040 }
  0x8c   :  { %42 = vsyncpa [#allocation3], 1 }

</bundles_post_ra>
